<compile_context>
chip_gen: v6e
topology: v6e:2x2x1
jax: 0.10.0
libtpu: 0.0.40
codegen_flags: <defaults>
</compile_context>

<pallas_src>
import jax
import jax.numpy as jnp
from jax.experimental import pallas as pl
from jax.experimental.pallas import tpu as pltpu


def _round_up(x: int, m: int) -> int:
    return (x + m - 1) // m * m


def _ultragcn_score_kernel(u_ref, i_ref, o_ref):
    # u_ref, i_ref: (D, TB) bf16 tiles in VMEM; o_ref: (1, TB) f32 tile.
    u = u_ref[...].astype(jnp.float32)          # f32 compute (v5e-safe)
    v = i_ref[...].astype(jnp.float32)
    s = jnp.sum(u * v, axis=0, keepdims=True)   # sublane-axis reduce -> (1, TB)
    o_ref[...] = jax.nn.sigmoid(s)              # lane-dense store


def ultragcn_scores(u_cols, i_cols, *, tile_b: int = 1024):
    """sigmoid(sum(u * i, axis=0)) for column-major per-example embeddings.

    u_cols, i_cols: (D, B) arrays with the batch on the lane axis.
    Returns (B,) float32 scores.
    """
    assert u_cols.shape == i_cols.shape and u_cols.ndim == 2
    assert tile_b % 128 == 0
    D, B = u_cols.shape

    # Batch tile: multiple of 128 lanes. Per grid step the pipeline holds
    # 2 inputs x 2 buffers x (D*TB*2 B) + output buffers; e.g. D=128, TB=1024
    # bf16 is ~1 MiB, far below the 32 MiB scoped default (and v7x's 64 MiB
    # physical VMEM), so no vmem_limit_bytes override is needed at this TB.
    TB = min(tile_b, _round_up(B, 128))
    Bp = _round_up(B, TB)
    if Bp != B:
        pad = Bp - B
        u_cols = jnp.pad(u_cols, ((0, 0), (0, pad)))
        i_cols = jnp.pad(i_cols, ((0, 0), (0, pad)))

    grid = (pl.cdiv(Bp, TB),)
    itemsize = jnp.dtype(u_cols.dtype).itemsize
    cost = pl.CostEstimate(
        flops=2 * Bp * D,
        transcendentals=Bp,                              # exp inside sigmoid
        bytes_accessed=2 * Bp * D * itemsize + Bp * 4,
    )

    out = pl.pallas_call(
        _ultragcn_score_kernel,
        out_shape=jax.ShapeDtypeStruct((1, Bp), jnp.float32),
        grid_spec=pltpu.PrefetchScalarGridSpec(
            num_scalar_prefetch=0,
            grid=grid,
            in_specs=[
                pl.BlockSpec((D, TB), lambda i: (0, i)),
                pl.BlockSpec((D, TB), lambda i: (0, i)),
            ],
            out_specs=pl.BlockSpec((1, TB), lambda i: (0, i)),
        ),
        compiler_params=pltpu.CompilerParams(
            dimension_semantics=("parallel",),   # v7x: shard batch grid over 2 TCs
        ),
        cost_estimate=cost,
    )(u_cols, i_cols)
    return out[0, :B]


class UltraGCNPallas:
    """JAX/Pallas replica of the UltraGCN forward pass."""

    def __init__(self, user_num, item_num, embedding_dim, gamma=1e-4,
                 lambda_=1e-3, key=None):
        self.user_num = user_num
        self.item_num = item_num
        self.embedding_dim = embedding_dim
        self.gamma = gamma          # loss-time hyperparameter, unused in forward
        self.lambda_ = lambda_      # loss-time hyperparameter, unused in forward
        # TODO(synk): constraint_mat is loaded from a pickle in the original
        # module but never used in forward(); omitted here.

        if key is None:
            key = jax.random.PRNGKey(0)
        ku, ki = jax.random.split(key)

        # xavier_normal_ on an (N, D) embedding: std = sqrt(2 / (N + D)).
        # Tables are stored transposed (D, N) and in bfloat16 so gathered
        # activations are already lane-dense and HBM traffic is halved; all
        # arithmetic stays in f32 inside the kernel.
        u_std = (2.0 / (user_num + embedding_dim)) ** 0.5
        i_std = (2.0 / (item_num + embedding_dim)) ** 0.5
        self.user_embeds = (
            u_std * jax.random.normal(ku, (embedding_dim, user_num), jnp.float32)
        ).astype(jnp.bfloat16)
        self.item_embeds = (
            i_std * jax.random.normal(ki, (embedding_dim, item_num), jnp.float32)
        ).astype(jnp.bfloat16)

    def __call__(self, data):
        # data: (B, 2) int32, columns = (user_idx, item_idx)
        users = data[:, 0]
        items = data[:, 1]
        # Embedding lookup (glue); column gather keeps the (D, B) layout.
        # TODO(synk): fuse this gather into the Pallas kernel via scalar
        # prefetch + manual per-row DMA to cut HBM traffic further.
        u = jnp.take(self.user_embeds, users, axis=1)    # (D, B) bf16
        i = jnp.take(self.item_embeds, items, axis=1)    # (D, B) bf16
        return ultragcn_scores(u, i)                     # (B,) f32


if __name__ == "__main__":
    key = jax.random.PRNGKey(0)
    k_model, k_u, k_i = jax.random.split(key, 3)

    USER_NUM, ITEM_NUM, EMBED_DIM, BATCH = 16, 24, 32, 8

    model = UltraGCNPallas(
        user_num=USER_NUM,
        item_num=ITEM_NUM,
        embedding_dim=EMBED_DIM,
        gamma=1e-4,
        lambda_=1e-3,
        key=k_model,
    )

    users = jax.random.randint(k_u, (BATCH,), 0, USER_NUM, dtype=jnp.int32)
    items = jax.random.randint(k_i, (BATCH,), 0, ITEM_NUM, dtype=jnp.int32)
    data = jnp.stack([users, items], axis=1)             # (B, 2)

    out = model(data)
    out = jax.block_until_ready(out)

    # Reference check in plain JAX (same bf16 storage, f32 math).
    u_ref = jnp.take(model.user_embeds, users, axis=1).astype(jnp.float32)
    i_ref = jnp.take(model.item_embeds, items, axis=1).astype(jnp.float32)
    ref = jax.nn.sigmoid(jnp.sum(u_ref * i_ref, axis=0))
    assert out.shape == (BATCH,)
    assert jnp.allclose(out, ref, atol=1e-5, rtol=1e-5), (out, ref)

    print("KERNEL_OK")
</pallas_src>

<mosaic_0001>
module attributes {stable_mosaic.version = 11 : i64} {
  func.func @_ultragcn_score_kernel(%arg0: i32, %arg1: memref<32x128xbf16, #tpu.memory_space<vmem>>, %arg2: memref<32x128xbf16, #tpu.memory_space<vmem>>, %arg3: memref<1x128xf32, #tpu.memory_space<vmem>>) attributes {dimension_semantics = [#tpu.dimension_semantics<parallel>], iteration_bounds = array<i64: 1>, scalar_prefetch = 0 : i64, scratch_operands = 0 : i64, tpu.core_type = #tpu.core_type<tc>, window_params = [{transform_indices = @transform_0, window_bounds = array<i64: 32, 128>}, {transform_indices = @transform_1, window_bounds = array<i64: 32, 128>}, {transform_indices = @transform_2, window_bounds = array<i64: 1, 128>}]} {
    %c0 = arith.constant 0 : index
    %c0_0 = arith.constant 0 : index
    %0 = vector.load %arg1[%c0, %c0_0] : memref<32x128xbf16, #tpu.memory_space<vmem>>, vector<32x128xbf16>
    %1 = arith.extf %0 : vector<32x128xbf16> to vector<32x128xf32>
    %c0_1 = arith.constant 0 : index
    %c0_2 = arith.constant 0 : index
    %2 = vector.load %arg2[%c0_1, %c0_2] : memref<32x128xbf16, #tpu.memory_space<vmem>>, vector<32x128xbf16>
    %3 = arith.extf %2 : vector<32x128xbf16> to vector<32x128xf32>
    %4 = arith.mulf %1, %3 : vector<32x128xf32>
    %cst = arith.constant dense<0.000000e+00> : vector<128xf32>
    %5 = vector.multi_reduction <add>, %4, %cst [0] : vector<32x128xf32> to vector<128xf32>
    %6 = vector.shape_cast %5 : vector<128xf32> to vector<1x128xf32>
    %7 = arith.negf %6 : vector<1x128xf32>
    %8 = math.exp %7 : vector<1x128xf32>
    %cst_3 = arith.constant 1.000000e+00 : f32
    %9 = vector.broadcast %cst_3 : f32 to vector<1x128xf32>
    %10 = arith.addf %9, %8 : vector<1x128xf32>
    %11 = arith.divf %9, %10 : vector<1x128xf32>
    %c0_4 = arith.constant 0 : index
    %c0_5 = arith.constant 0 : index
    %12 = vector.load %arg3[%c0_4, %c0_5] : memref<1x128xf32, #tpu.memory_space<vmem>>, vector<1x128xf32>
    tpu.vector_store %arg3[%c0_4, %c0_5], %11 {strides = array<i32>} : memref<1x128xf32, #tpu.memory_space<vmem>>, vector<1x128xf32>,
    return
  }
  func.func @transform_0(%arg0: i32) -> (i32, i32) {
    %c0_i32 = arith.constant 0 : i32
    %c0_i32_0 = arith.constant 0 : i32
    return %c0_i32, %arg0 : i32, i32
  }
  func.func @transform_1(%arg0: i32) -> (i32, i32) {
    %c0_i32 = arith.constant 0 : i32
    %c0_i32_0 = arith.constant 0 : i32
    return %c0_i32, %arg0 : i32, i32
  }
  func.func @transform_2(%arg0: i32) -> (i32, i32) {
    %c0_i32 = arith.constant 0 : i32
    %c0_i32_0 = arith.constant 0 : i32
    return %c0_i32, %arg0 : i32, i32
  }
}

</mosaic_0001>

<bundles_post_ra>
// kernel: tpu_custom_call.1
= control target key start
LH: loop header
LB: loop body
LE: loop exit
PB: predicated region body
PF: predicated region fallthrough
CT: control target
= control target key end

     0   :  { %7 = vsyncpa [#allocation3], 0  ;;  %s215_s0 = inlined_call_operand.hbm [shape: bf16[32,128], index: 0, kind: input, shape index: {}]   ;;  %s216_s1 = inlined_call_operand.hbm [shape: bf16[32,128], index: 1, kind: input, shape index: {}]   ;;  %s217_s2 = inlined_call_operand.hbm [shape: f32[1,128], index: 2, kind: output, shape index: {}]  }
   0x1   :  { %8 = vsyncpa [#allocation6], 0 }
   0x2   :  { %9 = vsyncpa [#allocation4], 0  ;;  %s186_s9 = smov [#allocation2]  }
   0x3   :  { %s15_s10 = sshll.u32 %s186_s9, 4  ;;  %s16_s10 = int_to_ptr.vmem [resolvable:$true] %s15_s10 }
   0x4   :  { %s128_s11 = scalar_lea.vmem %s16_s10, 256  ;;  %p133_p1 = scmp.lt.s32.totalorder %s16_s10, %s16_s10 }
   0x5   :  { %p129_p0 = scmp.ne.s32.totalorder %s16_s10, %s128_s11  ;;  %p134_p2 = scmp.lt.s32.totalorder %s128_s11, %s128_s11 }
   0x7   :  { %p135_p3 = por %p134_p2, %p133_p1 }
   0x9   :  { %p136_p4 = pnand %p135_p3, %p129_p0 }
   0xb   :  { %139 = shalt.err (!%p136_p4)
}
   0xc   :  { %s187_s12 = smov 64   ;;  %s188_s13 = smov 4  }
   0xd   :  { %21 = dma.hbm_to_vmem [thread:$0]  %s215_s0, 256, %s16_s10, [#allocation3], %s187_s12, %s187_s12, %s188_s13  }
   0xe   :  { %s189_s16 = smov [#allocation5]  }
   0xf   :  { %s27_s17 = sshll.u32 %s189_s16, 4  ;;  %s28_s17 = int_to_ptr.vmem [resolvable:$true] %s27_s17 }
  0x10   :  { %s148_s18 = scalar_lea.vmem %s28_s17, 256  ;;  %p153_p6 = scmp.lt.s32.totalorder %s28_s17, %s28_s17 }
  0x11   :  { %p149_p5 = scmp.ne.s32.totalorder %s28_s17, %s148_s18  ;;  %p154_p7 = scmp.lt.s32.totalorder %s148_s18, %s148_s18 }
  0x13   :  { %p155_p8 = por %p154_p7, %p153_p6 }
  0x15   :  { %p156_p9 = pnand %p155_p8, %p149_p5 }
  0x17   :  { %159 = shalt.err (!%p156_p9)
}
  0x18   :  { %33 = dma.hbm_to_vmem [thread:$0]  %s216_s1, 256, %s28_s17, [#allocation6], %s187_s12, %s187_s12, %s188_s13  }
  0x19   :  { %180 = dma.done.wait [#allocation3], 256  }
  0x1a   :  { %181 = vsyncadd [#allocation3], 4294967040 }
  0x1b   :  { %182 = dma.done.wait [#allocation6], 256  }
  0x1c   :  { %183 = vsyncadd [#allocation6], 4294967040  ;;  %v94_v0 = vld [vmem:[#allocation2] sm:$0xff]   ;;  %v109_v1 = vld [vmem:[#allocation2 + $0x8] sm:$0xff]   ;;  %s190_s0 = smov [#allocation7]  }
  0x1d   :  { %v102_v2 = vld [vmem:[#allocation5] sm:$0xff]   ;;  %v95_v3 = vunpack.c.l.bf16 %v94_v0  ;;  %v96_v4 = vunpack.c.h.bf16 %v94_v0  ;;  %v99_v5 = vunpack.c.l.bf16 %v109_v1  ;;  %v100_v6 = vunpack.c.h.bf16 %v109_v1  ;;  %v110_v7 = vld [vmem:[#allocation5 + $0x8] sm:$0xff]   ;;  %s82_s1 = sshll.u32 %s190_s0, 4  ;;  %s83_s1 = int_to_ptr.vmem [resolvable:$true] %s82_s1 }
  0x1e   :  { %v103_v8 = vunpack.c.l.bf16 %v102_v2  ;;  %v104_v9 = vunpack.c.h.bf16 %v102_v2  ;;  %v107_v10 = vunpack.c.l.bf16 %v110_v7  ;;  %v108_v11 = vunpack.c.h.bf16 %v110_v7  ;;  %s160_s21 = scalar_lea.vmem %s83_s1, 16  ;;  %s164_s22 = scalar_lea.vmem %s83_s1, 32 }
  0x1f   :  { %p161_p10 = scmp.ne.s32.totalorder %s83_s1, %s160_s21  ;;  %p165_p11 = scmp.lt.s32.totalorder %s83_s1, %s83_s1 }
  0x20   :  { %v56_v12 = vmul.f32 %v103_v8, %v95_v3  ;;  %v57_v13 = vmul.f32 %v104_v9, %v96_v4  ;;  %v58_v14 = vmul.f32 %v107_v10, %v99_v5  ;;  %v59_v15 = vmul.f32 %v108_v11, %v100_v6  ;;  %p166_p12 = scmp.lt.s32.totalorder %s164_s22, %s160_s21 }
  0x22   :  { %v60_v16 = vadd.f32 %v57_v13, %v56_v12  ;;  %p167_p13 = por %p166_p12, %p165_p11 }
  0x24   :  { %v61_v17 = vadd.f32 %v60_v16, %v58_v14  ;;  %p168_p0 = pnand %p167_p13, %p161_p10 }
  0x26   :  { %v62_v18 = vadd.f32 %v61_v17, %v59_v15 }
  0x28   :  { %v63_v19 = vrot.slane %v62_v18, 4 }
  0x2a   :  { %v64_v20 = vadd.f32 %v63_v19, %v62_v18 }
  0x2c   :  { %v65_v21 = vrot.slane %v64_v20, 2 }
  0x2e   :  { %v66_v22 = vadd.f32 %v65_v21, %v64_v20 }
  0x30   :  { %v67_v23 = vrot.slane %v66_v22, 1 }
  0x32   :  { %v68_v24 = vadd.f32 %v67_v23, %v66_v22 }
  0x34   :  { %v92_v25 = vmul.f32 -1.442695, %v68_v24 }
  0x36   :  { %116 = vpow2.f32 %v92_v25 }
  0x43   :  { %v117_v26 = vpop.eup %116 }
  0x44   :  { %v72_v27 = vadd.f32 1.0, %v117_v26 }
  0x46   :  { %118 = vrcp.f32 %v72_v27 }
  0x53   :  { %v119_v28 = vpop.eup %118 }
  0x54   :  { %75 = vst [vmem:[#allocation7] sm:$0x1] %v119_v28 }
  0x55   :  { %171 = shalt.err (!%p168_p0)
}
  0x56   :  { %85 = dma.vmem_to_hbm [thread:$0]  %s83_s1, 16, %s217_s2, [#allocation4]  }
  0x57   :  { %184 = dma.done.wait [#allocation4], 16  }
  0x58   :  { %185 = vsyncadd [#allocation4], 4294967280 }
  0x59   :  { %89 = vsyncpa [#allocation3], 1 }
  0x5a   :  { %90 = vsyncpa [#allocation6], 1 }
  0x5b   :  { %91 = vsyncpa [#allocation4], 1 }

</bundles_post_ra>
